<compile_context>
chip_gen: v7x
topology: tpu7x:2x2x1
jax: 0.10.0
libtpu: 0.0.40
codegen_flags: <defaults>
</compile_context>

<pallas_src>
import math

import jax
import jax.numpy as jnp
from jax.experimental import pallas as pl
from jax.experimental.pallas import tpu as pltpu

FILL_VALUE = -100.0  # fill_mode='constant', fill_value=-100.0 (module defaults)

# Flipped off (at trace/compile time) if this Pallas build rejects the
# rectangle-restricted + aliased variant; we then stream the full tensor.
_RESTRICTED_PATH_OK = True


def _cdiv(a: int, b: int) -> int:
    return -(-a // b)


def _round_up(a: int, m: int) -> int:
    return _cdiv(a, m) * m


def _largest_divisor_leq(n: int, k: int) -> int:
    k = max(1, min(n, k))
    for d in range(k, 0, -1):
        if n % d == 0:
            return d
    return 1


def _vmem_capacity_bytes() -> int:
    """Physical VMEM of the attached TPU (64 MiB v7x, 128 MiB v5e/v6e)."""
    try:
        cap = getattr(pltpu.get_tpu_info(), "vmem_capacity_bytes", None)
        if cap:
            return int(cap)
    except Exception:
        pass
    return 64 * 1024 * 1024  # conservative default (v7x)


# ---------------------------------------------------------------------------
# Random range generation: on-device port of gen_range (fully jittable).
# ---------------------------------------------------------------------------
def _static_cut_sizes(size, scales):
    """Static [min, max) of the sampled cutout length (mirrors gen_range)."""
    s0, s1 = tuple(scales)
    if isinstance(s0, float):
        cut_min = math.ceil(s0 * size)
        cut_max = max(math.ceil(s1 * size), cut_min + 1)
    else:
        cut_min, cut_max = int(s0), int(s1)
    return cut_min, cut_max


def _gen_range_device(size, scales, key):
    """gen_range on device: traced int32 (start, end) scalars."""
    cut_min, cut_max = _static_cut_sizes(size, scales)
    k_len, k_pos = jax.random.split(key)
    cut = jax.random.randint(k_len, (), cut_min, cut_max, dtype=jnp.int32)
    hi = jnp.maximum(size - cut + 1, 1)
    start = jax.random.randint(k_pos, (), 0, hi, dtype=jnp.int32)
    return start, start + cut


def cutout_bounds(time_size, freq_size, key, freq_size_range, time_size_range):
    """Traced (t0, t1, f0, f1) int32 bounds matching CutOutSpec's sampling."""
    k_f, k_t = jax.random.split(key)
    f0, f1 = _gen_range_device(freq_size, freq_size_range, k_f)
    t0, t1 = _gen_range_device(time_size, time_size_range, k_t)
    return t0, t1, f0, f1


# ---------------------------------------------------------------------------
# Pallas kernel.
# ---------------------------------------------------------------------------
def _make_kernel(block_t, n_t_blocks, restricted, fill_value):
    def kernel(bounds_ref, x_ref, o_ref):
        # bounds_ref: SMEM int32[4] = [t0, t1, f0, f1]  (scalar prefetch)
        # x_ref / o_ref: VMEM (block_n, block_t, F)
        t0 = bounds_ref[0]
        t1 = bounds_ref[1]
        f0 = bounds_ref[2]
        f1 = bounds_ref[3]
        gt = pl.program_id(1)
        if restricted:
            # Same data-dependent block index the index_map used.
            t_blk = jnp.minimum(t0 // block_t + gt, n_t_blocks - 1)
        else:
            t_blk = gt
        F = x_ref.shape[-1]
        # (block_t, F) rectangle mask, shared by every leading index of this
        # block -> the per-element work is a single select.
        t_idx = t_blk * block_t + jax.lax.broadcasted_iota(
            jnp.int32, (block_t, F), 0
        )
        f_idx = jax.lax.broadcasted_iota(jnp.int32, (block_t, F), 1)
        in_rect = (t_idx >= t0) & (t_idx < t1) & (f_idx >= f0) & (f_idx < f1)
        x = x_ref[...]
        o_ref[...] = jnp.where(
            in_rect[None, :, :], jnp.asarray(fill_value, x.dtype), x
        )

    return kernel


def _cutout_pallas(x_ntf, bounds, max_len_t, fill_value, force_full=False):
    """Apply the constant-fill cutout to (N, T, F); bounds = [t0, t1, f0, f1]."""
    N, T, F = x_ntf.shape
    itemsize = jnp.dtype(x_ntf.dtype).itemsize
    sub = 8 if itemsize >= 4 else (16 if itemsize == 2 else 32)  # sublane granule

    vmem_cap = _vmem_capacity_bytes()
    block_cap = vmem_cap // 8             # per-block cap (in+out double-buffered)
    block_target = min(1 << 20, block_cap)  # aim for ~1 MiB blocks

    # --- time blocking: smallish blocks so we can visit only the rectangle ---
    if T <= sub:
        block_t = T
    else:
        bt = _round_up(max(sub, _cdiv(max_len_t, 4)), sub)
        bt = min(bt, _round_up(T, sub))
        bt_cap = max(sub, (block_cap // max(1, F * itemsize)) // sub * sub)
        block_t = max(sub, min(bt, bt_cap))
    n_t_blocks = _cdiv(T, block_t)
    # Blocks that can intersect [t0, t1): ceil(max_len/bT) + 1 for misalignment.
    n_t_visit = min(n_t_blocks, _cdiv(max(1, max_len_t), block_t) + 1)
    restricted = (n_t_visit < n_t_blocks) and not force_full

    # --- leading-dim blocking: fill the budget, keep >=2 parallel steps ------
    slab = block_t * F * itemsize
    bn_vmem = max(1, block_target // max(1, slab))
    bn_par = max(1, N // 2) if N >= 2 else 1  # >=2 grid steps for v7x megacore
    block_n = _largest_divisor_leq(N, min(bn_vmem, bn_par))
    n_n_blocks = N // block_n

    grid_t = n_t_visit if restricted else n_t_blocks
    kernel = _make_kernel(block_t, n_t_blocks, restricted, fill_value)

    if restricted:

        def index_map(n, gt, bounds_ref):
            t_blk = jnp.minimum(bounds_ref[0] // block_t + gt, n_t_blocks - 1)
            return (n, t_blk, 0)

        # x is operand 1 (after the scalar-prefetch bounds).  Untouched blocks
        # keep their values through the alias instead of being streamed.
        io_aliases = {1: 0}
    else:

        def index_map(n, gt, bounds_ref):
            return (n, gt, 0)

        io_aliases = {}

    spec = pl.BlockSpec((block_n, block_t, F), index_map)

    touched_bytes = 2 * N * grid_t * block_t * F * itemsize  # read + write
    cost = pl.CostEstimate(
        flops=N * grid_t * block_t * F,
        transcendentals=0,
        bytes_accessed=touched_bytes + 4 * 4,
    )

    return pl.pallas_call(
        kernel,
        out_shape=jax.ShapeDtypeStruct((N, T, F), x_ntf.dtype),
        grid_spec=pltpu.PrefetchScalarGridSpec(
            num_scalar_prefetch=1,
            grid=(n_n_blocks, grid_t),
            in_specs=[spec],
            out_specs=spec,
        ),
        input_output_aliases=io_aliases,
        compiler_params=pltpu.CompilerParams(
            dimension_semantics=("parallel", "arbitrary"),
            vmem_limit_bytes=min(vmem_cap // 2, 64 * 1024 * 1024),
        ),
        cost_estimate=cost,
    )(bounds, x_ntf)


def _apply_cutout(x, bounds, max_len_t, fill_value):
    global _RESTRICTED_PATH_OK
    *lead, T, F = x.shape
    n = math.prod(lead) if lead else 1
    x_flat = x.reshape((max(n, 1), T, F))
    if _RESTRICTED_PATH_OK:
        try:
            out = _cutout_pallas(x_flat, bounds, max_len_t, fill_value)
            return out.reshape(x.shape)
        except Exception:
            # Safety net: if this Pallas/Mosaic build rejects the aliased,
            # rectangle-restricted variant, stream the full tensor instead.
            _RESTRICTED_PATH_OK = False
    out = _cutout_pallas(x_flat, bounds, max_len_t, fill_value, force_full=True)
    return out.reshape(x.shape)


# TODO(synk): fill_mode='random', tuple fill_value (sampled fill) and custom
# nn.Module fill transforms are not implemented; this covers the module's
# default fill_mode='constant' with a static float fill value.
def cutout_spec(
    x,
    key,
    freq_size_range=(0.1, 0.5),
    time_size_range=(0.1, 0.5),
    p=1.0,
    fill_value=FILL_VALUE,
):
    """Functional equivalent of CutOutSpec.forward for inputs (..., time, freq)."""
    if x.ndim < 2:
        raise ValueError("CutOutSpec input must have at least 2 dimensions.")
    if p <= 0.0:
        return x
    if p < 1.0:
        key, k_p = jax.random.split(key)

    T, F = x.shape[-2], x.shape[-1]
    t0, t1, f0, f1 = cutout_bounds(T, F, key, freq_size_range, time_size_range)
    bounds = jnp.stack([t0, t1, f0, f1]).astype(jnp.int32)

    _, cut_max_t = _static_cut_sizes(T, time_size_range)
    max_len_t = max(1, min(T, cut_max_t - 1))  # static max rectangle length (time)

    if p >= 1.0:
        return _apply_cutout(x, bounds, max_len_t, fill_value)

    gate = jax.random.uniform(k_p, ()) < p
    return jax.lax.cond(
        gate,
        lambda xx: _apply_cutout(xx, bounds, max_len_t, fill_value),
        lambda xx: xx,
        x,
    )


if __name__ == "__main__":
    key = jax.random.PRNGKey(0)
    k_data, k_aug = jax.random.split(key)

    def reference(x, key, freq_range=(0.1, 0.5), time_range=(0.1, 0.5)):
        T, F = x.shape[-2], x.shape[-1]
        t0, t1, f0, f1 = cutout_bounds(T, F, key, freq_range, time_range)
        t_idx = jnp.arange(T, dtype=jnp.int32)[:, None]
        f_idx = jnp.arange(F, dtype=jnp.int32)[None, :]
        mask = (t_idx >= t0) & (t_idx < t1) & (f_idx >= f0) & (f_idx < f1)
        return jnp.where(mask, jnp.asarray(FILL_VALUE, x.dtype), x)

    # Case 1: small input like the module docstring (batch=2, ch=4, time=16, freq=16).
    x1 = jax.random.uniform(k_data, (2, 4, 16, 16), dtype=jnp.float32)
    y1 = jax.block_until_ready(cutout_spec(x1, k_aug))
    ref1 = reference(x1, k_aug)
    assert y1.shape == x1.shape and y1.dtype == x1.dtype
    assert jnp.allclose(y1, ref1), "case 1: mismatch vs reference"
    assert bool(jnp.any(y1 == FILL_VALUE)), "case 1: cutout not applied"

    # Case 2: taller spectrogram -> exercises the rectangle-restricted aliased path.
    k_data2, k_aug2 = jax.random.split(k_aug)
    x2 = jax.random.uniform(k_data2, (2, 2, 64, 32), dtype=jnp.float32)
    ref2 = reference(x2, k_aug2)
    y2 = jax.block_until_ready(cutout_spec(x2, k_aug2))
    assert jnp.allclose(y2, ref2), "case 2: mismatch vs reference"
    assert bool(jnp.any(y2 == FILL_VALUE)), "case 2: cutout not applied"
    assert not bool(jnp.any(x2 == FILL_VALUE)), "case 2: input modified in place"

    # Same transform under jit (bounds generated on-device; no host syncs).
    y2_jit = jax.block_until_ready(jax.jit(cutout_spec)(x2, k_aug2))
    assert jnp.allclose(y2_jit, ref2), "case 2 (jit): mismatch vs reference"

    print("KERNEL_OK")
</pallas_src>

<mosaic_0001>
module attributes {stable_mosaic.version = 11 : i64} {
  func.func @kernel(%arg0: i32, %arg1: i32, %arg2: memref<4xi32, #tpu.memory_space<smem>>, %arg3: memref<4x8x16xf32, #tpu.memory_space<vmem>>, %arg4: memref<4x8x16xf32, #tpu.memory_space<vmem>>) attributes {dimension_semantics = [#tpu.dimension_semantics<parallel>, #tpu.dimension_semantics<arbitrary>], iteration_bounds = array<i64: 2, 2>, scalar_prefetch = 1 : i64, scratch_operands = 0 : i64, tpu.core_type = #tpu.core_type<tc>, window_params = [{transform_indices = @transform_0, window_bounds = array<i64: 4, 8, 16>}, {transform_indices = @transform_1, window_bounds = array<i64: 4, 8, 16>}]} {
    %c0 = arith.constant 0 : index
    %0 = memref.load %arg2[%c0] : memref<4xi32, #tpu.memory_space<smem>>
    %c1 = arith.constant 1 : index
    %1 = memref.load %arg2[%c1] : memref<4xi32, #tpu.memory_space<smem>>
    %c2 = arith.constant 2 : index
    %2 = memref.load %arg2[%c2] : memref<4xi32, #tpu.memory_space<smem>>
    %c3 = arith.constant 3 : index
    %3 = memref.load %arg2[%c3] : memref<4xi32, #tpu.memory_space<smem>>
    %c8_i32 = arith.constant 8 : i32
    %4 = arith.muli %arg1, %c8_i32 : i32
    %5 = tpu.iota {dimensions = array<i32: 0>} : vector<8x16xi32>
    %6 = vector.broadcast %4 : i32 to vector<8x16xi32>
    %7 = arith.addi %6, %5 : vector<8x16xi32>
    %8 = tpu.iota {dimensions = array<i32: 1>} : vector<8x16xi32>
    %9 = vector.broadcast %0 : i32 to vector<8x16xi32>
    %10 = arith.cmpi sge, %7, %9 : vector<8x16xi32>
    %11 = vector.broadcast %1 : i32 to vector<8x16xi32>
    %12 = arith.cmpi slt, %7, %11 : vector<8x16xi32>
    %13 = arith.andi %10, %12 : vector<8x16xi1>
    %14 = vector.broadcast %2 : i32 to vector<8x16xi32>
    %15 = arith.cmpi sge, %8, %14 : vector<8x16xi32>
    %16 = arith.andi %13, %15 : vector<8x16xi1>
    %17 = vector.broadcast %3 : i32 to vector<8x16xi32>
    %18 = arith.cmpi slt, %8, %17 : vector<8x16xi32>
    %19 = arith.andi %16, %18 : vector<8x16xi1>
    %c0_0 = arith.constant 0 : index
    %c0_1 = arith.constant 0 : index
    %c0_2 = arith.constant 0 : index
    %20 = vector.load %arg3[%c0_0, %c0_1, %c0_2] : memref<4x8x16xf32, #tpu.memory_space<vmem>>, vector<4x8x16xf32>
    %21 = vector.shape_cast %19 : vector<8x16xi1> to vector<1x8x16xi1>
    %cst = arith.constant -1.000000e+02 : f32
    %22 = vector.shape_cast %21 : vector<1x8x16xi1> to vector<1x8x16xi1>
    %23 = vector.broadcast %22 : vector<1x8x16xi1> to vector<4x8x16xi1>
    %24 = vector.broadcast %cst : f32 to vector<4x8x16xf32>
    %25 = arith.select %23, %24, %20 : vector<4x8x16xi1>, vector<4x8x16xf32>
    %c0_3 = arith.constant 0 : index
    %c0_4 = arith.constant 0 : index
    %c0_5 = arith.constant 0 : index
    %26 = vector.load %arg4[%c0_3, %c0_4, %c0_5] : memref<4x8x16xf32, #tpu.memory_space<vmem>>, vector<4x8x16xf32>
    tpu.vector_store %arg4[%c0_3, %c0_4, %c0_5], %25 {strides = array<i32>} : memref<4x8x16xf32, #tpu.memory_space<vmem>>, vector<4x8x16xf32>,
    return
  }
  func.func @transform_0(%arg0: i32, %arg1: i32, %arg2: memref<4xi32, #tpu.memory_space<smem>>) -> (i32, i32, i32) {
    %c0_i32 = arith.constant 0 : i32
    %c0_i32_0 = arith.constant 0 : i32
    return %arg0, %arg1, %c0_i32 : i32, i32, i32
  }
  func.func @transform_1(%arg0: i32, %arg1: i32, %arg2: memref<4xi32, #tpu.memory_space<smem>>) -> (i32, i32, i32) {
    %c0_i32 = arith.constant 0 : i32
    %c0_i32_0 = arith.constant 0 : i32
    return %arg0, %arg1, %c0_i32 : i32, i32, i32
  }
}

module attributes {stable_mosaic.version = 11 : i64} {
  func.func @kernel(%arg0: i32, %arg1: i32, %arg2: memref<4xi32, #tpu.memory_space<smem>>, %arg3: memref<4x8x16xf32, #tpu.memory_space<vmem>>, %arg4: memref<4x8x16xf32, #tpu.memory_space<vmem>>) attributes {dimension_semantics = [#tpu.dimension_semantics<parallel>, #tpu.dimension_semantics<arbitrary>], iteration_bounds = array<i64: 2, 2>, scalar_prefetch = 1 : i64, scratch_operands = 0 : i64, tpu.core_type = #tpu.core_type<tc>, window_params = [{transform_indices = @transform_0, window_bounds = array<i64: 4, 8, 16>}, {transform_indices = @transform_1, window_bounds = array<i64: 4, 8, 16>}]} {
    %c0 = arith.constant 0 : index
    %0 = memref.load %arg2[%c0] : memref<4xi32, #tpu.memory_space<smem>>
    %c1 = arith.constant 1 : index
    %1 = memref.load %arg2[%c1] : memref<4xi32, #tpu.memory_space<smem>>
    %c2 = arith.constant 2 : index
    %2 = memref.load %arg2[%c2] : memref<4xi32, #tpu.memory_space<smem>>
    %c3 = arith.constant 3 : index
    %3 = memref.load %arg2[%c3] : memref<4xi32, #tpu.memory_space<smem>>
    %c8_i32 = arith.constant 8 : i32
    %4 = arith.muli %arg1, %c8_i32 : i32
    %5 = tpu.iota {dimensions = array<i32: 0>} : vector<8x16xi32>
    %6 = vector.broadcast %4 : i32 to vector<8x16xi32>
    %7 = arith.addi %6, %5 : vector<8x16xi32>
    %8 = tpu.iota {dimensions = array<i32: 1>} : vector<8x16xi32>
    %9 = vector.broadcast %0 : i32 to vector<8x16xi32>
    %10 = arith.cmpi sge, %7, %9 : vector<8x16xi32>
    %11 = vector.broadcast %1 : i32 to vector<8x16xi32>
    %12 = arith.cmpi slt, %7, %11 : vector<8x16xi32>
    %13 = arith.andi %10, %12 : vector<8x16xi1>
    %14 = vector.broadcast %2 : i32 to vector<8x16xi32>
    %15 = arith.cmpi sge, %8, %14 : vector<8x16xi32>
    %16 = arith.andi %13, %15 : vector<8x16xi1>
    %17 = vector.broadcast %3 : i32 to vector<8x16xi32>
    %18 = arith.cmpi slt, %8, %17 : vector<8x16xi32>
    %19 = arith.andi %16, %18 : vector<8x16xi1>
    %c0_0 = arith.constant 0 : index
    %c0_1 = arith.constant 0 : index
    %c0_2 = arith.constant 0 : index
    %20 = vector.load %arg3[%c0_0, %c0_1, %c0_2] : memref<4x8x16xf32, #tpu.memory_space<vmem>>, vector<4x8x16xf32>
    %21 = vector.shape_cast %19 : vector<8x16xi1> to vector<1x8x16xi1>
    %cst = arith.constant -1.000000e+02 : f32
    %22 = vector.shape_cast %21 : vector<1x8x16xi1> to vector<1x8x16xi1>
    %23 = vector.broadcast %22 : vector<1x8x16xi1> to vector<4x8x16xi1>
    %24 = vector.broadcast %cst : f32 to vector<4x8x16xf32>
    %25 = arith.select %23, %24, %20 : vector<4x8x16xi1>, vector<4x8x16xf32>
    %c0_3 = arith.constant 0 : index
    %c0_4 = arith.constant 0 : index
    %c0_5 = arith.constant 0 : index
    %26 = vector.load %arg4[%c0_3, %c0_4, %c0_5] : memref<4x8x16xf32, #tpu.memory_space<vmem>>, vector<4x8x16xf32>
    tpu.vector_store %arg4[%c0_3, %c0_4, %c0_5], %25 {strides = array<i32>} : memref<4x8x16xf32, #tpu.memory_space<vmem>>, vector<4x8x16xf32>,
    return
  }
  func.func @transform_0(%arg0: i32, %arg1: i32, %arg2: memref<4xi32, #tpu.memory_space<smem>>) -> (i32, i32, i32) {
    %c0_i32 = arith.constant 0 : i32
    %c0_i32_0 = arith.constant 0 : i32
    return %arg0, %arg1, %c0_i32 : i32, i32, i32
  }
  func.func @transform_1(%arg0: i32, %arg1: i32, %arg2: memref<4xi32, #tpu.memory_space<smem>>) -> (i32, i32, i32) {
    %c0_i32 = arith.constant 0 : i32
    %c0_i32_0 = arith.constant 0 : i32
    return %arg0, %arg1, %c0_i32 : i32, i32, i32
  }
}

</mosaic_0001>

<bundles_post_ra>
// kernel: tpu_custom_call.1
= control target key start
LH: loop header
LB: loop body
LE: loop exit
PB: predicated region body
PF: predicated region fallthrough
CT: control target
= control target key end

     0   :  { %s789_s0 = inlined_call_operand.hbm [shape: s32[4], index: 0, kind: input, shape index: {}]   ;;  %s790_s1 = inlined_call_operand.hbm [shape: f32[8,16,16], index: 1, kind: input, shape index: {}]   ;;  %s791_s2 = inlined_call_operand.hbm [shape: f32[8,16,16], index: 2, kind: output, shape index: {}]  }
   0x1   :  { %s409_s11 = scalar_lea.hbm %s789_s0, 16 }
   0x2   :  { %p410_p0 = scmp.ne.s32.totalorder %s789_s0, %s409_s11  ;;  %p413_p1 = scmp.lt.u32.totalorder %s409_s11, %s789_s0 }
   0x4   :  { %p415_p2 = pnand %p413_p1, %p410_p0 }
   0x6   :  { %418 = shalt.err (!%p415_p2)  }
   0x7   :  { %s551_s16 = smov [#allocation3]  }
   0x8   :  { %8 = dma.hbm_to_smem %s789_s0, 16, %s551_s16, [#allocation2] }
   0x9   :  { %509 = dma.done.wait [#allocation2], 16 }
   0xa   :  { %510 = vsyncadd [#allocation2], 4294967280 }
   0xb   :  { %10 = sfence }
   0xc   :  { %11 = vsyncpa [#allocation5], 0 }
   0xd   :  { %13 = vsyncpa [#allocation5 + $0x1], 0 }
   0xe   :  { %14 = vsyncpa [#allocation6], 0 }
   0xf   :  { %16 = vsyncpa [#allocation6 + $0x1], 0  ;;  %s587_s19 = smov 0   ;;  %s589_s20 = smov 0  }
  0x10   :  { %s591_s21 = smov 0   ;;  %s593_s22 = smov 0  }
  0x11   :  { %s595_s23 = smov 0   ;;  %s597_s24 = smov 0  }
  0x12   :  { %s599_s0 = smov 0   ;;  %s601_s25 = smov 0  }
  0x13 LB: > { %s301_s26 = sadd.s32 4294967295, %s549_s25   ;;  %s302_s27 = sadd.s32 4294967294, %s549_s25   ;;  %s549_s25 = sphi %s601_s25, %s22_s25   ;;  %s545_s0 = sphi %s599_s0, %s806_s0   ;;  %s541_s24 = sphi %s597_s24, %s805_s24   ;;  %s537_s23 = sphi %s595_s23, %s804_s23   ;;  %s533_s22 = sphi %s593_s22, %s803_s22   ;;  %s529_s21 = sphi %s591_s21, %s802_s21   ;;  %s525_s20 = sphi %s589_s20, %s801_s20   ;;  %s521_s19 = sphi %s587_s19, %s800_s19  }
  0x14   : > { %s31_s28 = sadd.s32 1, %s541_s24  ;;  %s34_s29 = sadd.s32 1, %s545_s0 }
  0x15   : > { %p32_p3 = scmp.ge.s32.totalorder %s31_s28, 2  ;;  %s43_s30 = sadd.s32 1, %s529_s21 }
  0x16   : > { %p50_p4 = scmp.ne.s32.totalorder %s529_s21, %s525_s20  ;;  %p51_p5 = scmp.eq.s32.totalorder %s549_s25, 0 }
  0x17   : > { %s808_s28 = smov (%p32_p3, %s31_s28), 0  ;;  %s810_s29 = smov (!%p32_p3, %s34_s29), %s545_s0 }
  0x18   : > { %s39_s3 = ssub.s32 %s541_s24, %s808_s28  ;;  %p640_p6 = por %p51_p5, %p50_p4 }
  0x19   : > { %p36_p7 = scmp.ge.s32.totalorder %s810_s29, 2  ;;  %p56_p8 = scmp.ne.s32.totalorder %s525_s20, %s521_s19 }
  0x1a   : > { %p57_p9 = scmp.eq.s32.totalorder %s301_s26, 0  ;;  %p82_p10 = scmp.eq.s32.totalorder %s301_s26, 3 }
  0x1b   : > { %s812_s29 = smov (%p36_p7, %s810_s29), 0  ;;  %p88_p13 = scmp.eq.s32.totalorder %s302_s27, 3 }
  0x1c   : > { %p648_p11 = por %p57_p9, %p56_p8  ;;  %p652_p12 = por %p82_p10, %p50_p4 }
  0x1d   : > { %s38_s7 = ssub.s32 %s545_s0, %s812_s29  ;;  %p658_p1 = por %p88_p13, %p56_p8 }
  0x1e   : > { %s795_s6 = scalar_select %p652_p12, 1, 0 }
  0x1f   : > { %s40_s8 = sor.u32 %s39_s3, %s38_s7  ;;  %p336_p2 = scmp.lt.s32.totalorder %s549_s25, 4 }
  0x20   : > { %p41_p0 = scmp.eq.s32.totalorder %s40_s8, 0  ;;  %s108_s10 = sand.u32 1, %s529_s21  }
  0x21   : > { %s796_s9 = scalar_select %p658_p1, 1, 0 }
  0x22   : > { %s665_s11 = scalar_select %p41_p0, %s529_s21, %s43_s30  }
  0x23   : > { %s305_s12 = sshll.u32 %s108_s10, 5  ;;  %s322_s13 = sshll.u32 %s545_s0, 3 }
  0x24   : > { %s118_s14 = sadd.s32 %s541_s24, %s322_s13  ;;  %s112_s15 = scalar_lea.vmem [#allocation4], %s305_s12 }
  0x25   : > { %s121_s16 = sshll.u32 %s112_s15, 4  ;;  %s308_s17 = sshll.u32 %s118_s14, 7  ;;  %s669_s16 = int_to_ptr.vmem [resolvable:$true] %s121_s16 }
  0x26   : > { %s674_s27 = scalar_lea.hbm %s790_s1, %s308_s17  ;;  %p678_p3 = pnand %p336_p2, %p640_p6 }
  0x27   : > { %s682_s3 = scalar_lea.sflag [#allocation5], %s108_s10  ;;  %s419_s7 = scalar_lea.hbm %s674_s27, 512 }
  0x28   : > { %p420_p4 = scmp.ne.s32.totalorder %s674_s27, %s419_s7  ;;  %p421_p5 = pneg %p678_p3 }
  0x29   : > { %s424_s12 = scalar_lea.hbm %s790_s1, 2048  ;;  %p425_p6 = scmp.lt.u32.totalorder %s674_s27, %s790_s1 }
  0x2a   : > { %p422_p7 = pnand %p421_p5, %p420_p4  ;;  %p426_p9 = scmp.lt.u32.totalorder %s424_s12, %s419_s7 }
  0x2b   : > { %p428_p13 = scmp.lt.u32.totalorder %s419_s7, %s674_s27 }
  0x2c   : > { %p423_p8 = pneg %p422_p7  ;;  %p427_p10 = por %p426_p9, %p425_p6 }
  0x2e   : > { %p429_p0 = por %p428_p13, %p427_p10 }
  0x30   : > { %p430_p2 = pnand %p429_p0, %p423_p8 }
  0x32   : > { %433 = shalt.err (!%p430_p2)
}
  0x33   : > { %s434_s10 = scalar_lea.vmem %s669_s16, 512  ;;  %s552_s15 = smov [#allocation4]  }
  0x34   : > { %p435_p4 = scmp.ne.s32.totalorder %s669_s16, %s434_s10  ;;  %s439_s17 = sshll.u32 %s552_s15, 4  ;;  %s440_s17 = int_to_ptr.vmem [resolvable:$false] %s439_s17 }
  0x35   : > { %s441_s18 = scalar_lea.vmem %s440_s17, 1024  ;;  %p442_p12 = scmp.lt.s32.totalorder %s669_s16, %s440_s17 }
  0x36   : > { %p437_p7 = pnand %p435_p4, %p421_p5  ;;  %p443_p6 = scmp.lt.s32.totalorder %s441_s18, %s434_s10 }
  0x38   : > { %p438_p1 = pneg %p437_p7  ;;  %p444_p9 = por %p443_p6, %p442_p12 }
  0x3a   : > { %p445_p10 = pnand %p444_p9, %p438_p1 }
  0x3c   : > { %448 = shalt.err (!%p445_p10)
}
  0x3d   : > { %s553_s26 = smov 256   ;;  %s554_s7 = smov 128  }
  0x3e   : > { %s555_s4 = smov 8   ;;  %p309_p5 = scmp.ge.s32.totalorder %s549_s25, 1 }
  0x3f   : > { %331 = dma.hbm_to_vmem [thread:$0]  (!%p678_p3), %s674_s27, 512, %s669_s16, %s682_s3, %s553_s26, %s554_s7, %s555_s4  }
  0x40   : > { %p129_p8 = scmp.lt.s32.totalorder %s549_s25, 5 }
  0x42   : > { %p130_p13 = pnand %p309_p5, %p129_p8 }
  0x43   : > { %s713_s8 = sand.u32 (!%p130_p13), 1, %s525_s20  }
  0x44   : > { %133 = sbr.rel (%p130_p13) target bundleno = 107 (0x6b), region = 24  ;;  %s310_s12 = sshll.u32 (!%p130_p13), %s713_s8, 5 }
  0x45   : > { %s136_s13 = scalar_lea.sflag (!%p130_p13), [#allocation5], %s713_s8  ;;  %s717_s14 = scalar_lea.vmem (!%p130_p13), [#allocation4], %s310_s12 }
  0x4b   : > { %512 = dma.done.wait (%p648_p11), %s136_s13, 512  }
  0x4c   : > { %514 = vsyncadd (%p648_p11), %s136_s13, 4294966784  ;;  %s315_s16 = sshll.u32 %s533_s22, 3  ;;  %v165_v0 = vlaneseq  ;;  %s160_s27 = sld [smem:[#allocation3]]  ;;  %v182_v9 = vld [vmem:[%s717_s14] sm:$0xff]  ;;  %v183_v10 = vld [vmem:[%s717_s14 + $0x8] sm:$0xff]  ;;  %vm192_vm6 = vcmask 130048  }
  0x4d   : > { %s312_s30 = sld [smem:[#allocation3 + $0x1]]  ;;  %v167_v1 = vstv %s315_s16  ;;  %s313_s3 = sld [smem:[#allocation3 + $0x2]]  ;;  %v184_v11 = vld [vmem:[%s717_s14 + $0x10] sm:$0xff]  ;;  %v185_v12 = vld [vmem:[%s717_s14 + $0x18] sm:$0xff] }
  0x4e   : > { %s314_s10 = sld [smem:[#allocation3 + $0x3]]  ;;  %v166_v2 = vshrl.u32 %v165_v0, 7  ;;  %s323_s15 = sshll.u32 %s537_s23, 3  ;;  %v170_v4 = vand.u32 127, %v165_v0 }
  0x4f   : > { %s210_s17 = sadd.s32 %s533_s22, %s323_s15  ;;  %s157_s5 = scalar_lea.vmem [#allocation7], %s310_s12 }
  0x50   : > { %v168_v3 = vadd.s32 %v167_v1, %v166_v2  ;;  %s213_s18 = sshll.u32 %s157_s5, 4  ;;  %s319_s26 = sshll.u32 %s210_s17, 7  ;;  %s728_s18 = int_to_ptr.vmem [resolvable:$true] %s213_s18 }
  0x51   : > { %s735_s7 = scalar_lea.hbm %s791_s2, %s319_s26  ;;  %s198_s4 = scalar_lea.sflag [#allocation6], %s713_s8 }
  0x52   : > { %v171_v5 = vstv %s160_s27  ;;  %s449_s12 = scalar_lea.vmem %s728_s18, 512  ;;  %p798_p12 = scmp.ne.s32.totalorder %s795_s6, 0 }
  0x53   : > { %v173_v6 = vstv %s312_s30  ;;  %vm172_vm0 = vcmp.ge.s32.totalorder %v168_v3, %v171_v5  ;;  %v176_v7 = vstv %s313_s3  ;;  %p450_p11 = scmp.ne.s32.totalorder %s728_s18, %s449_s12  ;;  %s556_s13 = smov [#allocation7]  }
  0x54   : > { %vm174_vm1 = vcmp.lt.s32.totalorder %v168_v3, %v173_v6  ;;  %v179_v8 = vstv %s314_s10  ;;  %vm177_vm3 = vcmp.ge.s32.totalorder %v170_v4, %v176_v7  ;;  %s453_s14 = sshll.u32 %s556_s13, 4  ;;  %s454_s14 = int_to_ptr.vmem [resolvable:$false] %s453_s14 }
  0x55   : > { %vm175_vm2 = vmand %vm172_vm0, %vm174_vm1  ;;  %vm180_vm4 = vcmp.lt.s32.totalorder %v170_v4, %v179_v8  ;;  %p451_p1 = pnand %p450_p11, %p798_p12  ;;  %s455_s16 = scalar_lea.vmem %s454_s14, 1024 }
  0x56   : > { %vm178_vm5 = vmand %vm175_vm2, %vm177_vm3  ;;  %p456_p0 = scmp.lt.s32.totalorder %s728_s18, %s454_s14  ;;  %p457_p2 = scmp.lt.s32.totalorder %s455_s16, %s449_s12 }
  0x57   : > { %vm181_vm7 = vmand %vm178_vm5, %vm180_vm4  ;;  %p452_p3 = pneg %p451_p1 }
  0x58   : > { %v188_v13 = vsel %vm181_vm7, -100.0, %v182_v9  ;;  %v189_v14 = vsel %vm181_vm7, -100.0, %v183_v10  ;;  %v190_v15 = vsel %vm181_vm7, -100.0, %v184_v11  ;;  %v191_v16 = vsel %vm181_vm7, -100.0, %v185_v12  ;;  %p458_p4 = por %p457_p2, %p456_p0 }
  0x59   : > { %193 = vst.msk [vmem:[%s157_s5] sm:$0xff] %vm192_vm6, %v188_v13  ;;  %194 = vst.msk [vmem:[%s157_s5 + $0x8] sm:$0xff] %vm192_vm6, %v189_v14 }
  0x5a   : > { %195 = vst.msk [vmem:[%s157_s5 + $0x10] sm:$0xff] %vm192_vm6, %v190_v15  ;;  %196 = vst.msk [vmem:[%s157_s5 + $0x18] sm:$0xff] %vm192_vm6, %v191_v16  ;;  %p459_p7 = pnand %p458_p4, %p452_p3 }
  0x5c   : > { %462 = shalt.err (!%p459_p7)
}
  0x5d   : > { %s463_s27 = scalar_lea.hbm %s735_s7, 512  ;;  %s467_s10 = scalar_lea.hbm %s791_s2, 2048 }
  0x5e   : > { %p464_p6 = scmp.ne.s32.totalorder %s735_s7, %s463_s27  ;;  %p468_p5 = scmp.lt.u32.totalorder %s735_s7, %s791_s2 }
  0x5f   : > { %p469_p8 = scmp.lt.u32.totalorder %s467_s10, %s463_s27  ;;  %p471_p11 = scmp.lt.u32.totalorder %s463_s27, %s735_s7 }
  0x60   : > { %p465_p9 = pnand %p464_p6, %p798_p12 }
  0x61   : > { %p470_p13 = por %p469_p8, %p468_p5 }
  0x62   : > { %p466_p10 = pneg %p465_p9 }
  0x63   : > { %p472_p1 = por %p471_p11, %p470_p13 }
  0x65   : > { %p473_p3 = pnand %p472_p1, %p466_p10 }
  0x67   : > { %476 = shalt.err (!%p473_p3)
}
  0x68   : > { %s557_s5 = smov 128   ;;  %s558_s26 = smov 256  }
  0x69   : > { %s559_s22 = smov 8  }
  0x6a   : > { %326 = dma.vmem_to_hbm [thread:$0]  (%p798_p12), %s728_s18, 512, %s735_s7, %s198_s4, %s557_s5, %s558_s26, %s559_s22  }
  0x6b PF: > { %p337_p0 = scmp.ge.s32.totalorder %s549_s25, 2  ;;  %s228_s23 = sand.u32 1, %s521_s19  }
  0x6c   : > { %p799_p2 = scmp.ne.s32.totalorder %s796_s9, 0  ;;  %s229_s12 = scalar_lea.sflag [#allocation6], %s228_s23 }
  0x6e   : > { %p333_p4 = pnand %p337_p0, %p799_p2 }
  0x70   : > { %516 = dma.done.wait (!%p333_p4), %s229_s12, 512  }
  0x71   : > { %518 = vsyncadd (!%p333_p4), %s229_s12, 4294966784  ;;  %s22_s25 = sadd.s32 1, %s549_s25   ;;  %s800_s19 = smov %s525_s20 }
  0x72   : > { %p19_p7 = scmp.ge.s32.totalorder %s22_s25, 6   ;;  %s801_s20 = smov %s529_s21 }
  0x73   : > { %s802_s21 = smov %s665_s11  ;;  %s803_s22 = smov %s541_s24 }
  0x74   : > { %s804_s23 = smov %s545_s0  ;;  %s805_s24 = smov %s808_s28 }
  0x75   : > { %s806_s0 = smov %s812_s29  ;;  %21 = sbr.rel (!%p19_p7) target bundleno = 19 (0x13), region = 69 }
  0x7c   :  { %234 = vsyncpa [#allocation5], 1 }
  0x7d   :  { %236 = vsyncpa [#allocation5 + $0x1], 1 }
  0x7e   :  { %237 = vsyncpa [#allocation6], 1 }
  0x7f   :  { %239 = vsyncpa [#allocation6 + $0x1], 1 }

// kernel: tpu_custom_call.1
= control target key start
LH: loop header
LB: loop body
LE: loop exit
PB: predicated region body
PF: predicated region fallthrough
CT: control target
= control target key end

     0   :  { %s789_s0 = inlined_call_operand.hbm [shape: s32[4], index: 0, kind: input, shape index: {}]   ;;  %s790_s1 = inlined_call_operand.hbm [shape: f32[8,16,16], index: 1, kind: input, shape index: {}]   ;;  %s791_s2 = inlined_call_operand.hbm [shape: f32[8,16,16], index: 2, kind: output, shape index: {}]  }
   0x1   :  { %s409_s11 = scalar_lea.hbm %s789_s0, 16 }
   0x2   :  { %p410_p0 = scmp.ne.s32.totalorder %s789_s0, %s409_s11  ;;  %p413_p1 = scmp.lt.u32.totalorder %s409_s11, %s789_s0 }
   0x4   :  { %p415_p2 = pnand %p413_p1, %p410_p0 }
   0x6   :  { %418 = shalt.err (!%p415_p2)  }
   0x7   :  { %s551_s16 = smov [#allocation3]  }
   0x8   :  { %8 = dma.hbm_to_smem %s789_s0, 16, %s551_s16, [#allocation2] }
   0x9   :  { %509 = dma.done.wait [#allocation2], 16 }
   0xa   :  { %510 = vsyncadd [#allocation2], 4294967280 }
   0xb   :  { %10 = sfence }
   0xc   :  { %11 = vsyncpa [#allocation5], 0 }
   0xd   :  { %13 = vsyncpa [#allocation5 + $0x1], 0 }
   0xe   :  { %14 = vsyncpa [#allocation6], 0 }
   0xf   :  { %16 = vsyncpa [#allocation6 + $0x1], 0  ;;  %s587_s19 = smov 0   ;;  %s589_s20 = smov 0  }
  0x10   :  { %s591_s21 = smov 0   ;;  %s593_s22 = smov 0  }
  0x11   :  { %s595_s23 = smov 0   ;;  %s597_s24 = smov 0  }
  0x12   :  { %s599_s0 = smov 0   ;;  %s601_s25 = smov 0  }
  0x13 LB: > { %s301_s26 = sadd.s32 4294967295, %s549_s25   ;;  %s302_s27 = sadd.s32 4294967294, %s549_s25   ;;  %s549_s25 = sphi %s601_s25, %s22_s25   ;;  %s545_s0 = sphi %s599_s0, %s806_s0   ;;  %s541_s24 = sphi %s597_s24, %s805_s24   ;;  %s537_s23 = sphi %s595_s23, %s804_s23   ;;  %s533_s22 = sphi %s593_s22, %s803_s22   ;;  %s529_s21 = sphi %s591_s21, %s802_s21   ;;  %s525_s20 = sphi %s589_s20, %s801_s20   ;;  %s521_s19 = sphi %s587_s19, %s800_s19  }
  0x14   : > { %s31_s28 = sadd.s32 1, %s541_s24  ;;  %s34_s29 = sadd.s32 1, %s545_s0 }
  0x15   : > { %p32_p3 = scmp.ge.s32.totalorder %s31_s28, 2  ;;  %s43_s30 = sadd.s32 1, %s529_s21 }
  0x16   : > { %p50_p4 = scmp.ne.s32.totalorder %s529_s21, %s525_s20  ;;  %p51_p5 = scmp.eq.s32.totalorder %s549_s25, 0 }
  0x17   : > { %s808_s28 = smov (%p32_p3, %s31_s28), 0  ;;  %s810_s29 = smov (!%p32_p3, %s34_s29), %s545_s0 }
  0x18   : > { %s39_s3 = ssub.s32 %s541_s24, %s808_s28  ;;  %p640_p6 = por %p51_p5, %p50_p4 }
  0x19   : > { %p36_p7 = scmp.ge.s32.totalorder %s810_s29, 2  ;;  %p56_p8 = scmp.ne.s32.totalorder %s525_s20, %s521_s19 }
  0x1a   : > { %p57_p9 = scmp.eq.s32.totalorder %s301_s26, 0  ;;  %p82_p10 = scmp.eq.s32.totalorder %s301_s26, 3 }
  0x1b   : > { %s812_s29 = smov (%p36_p7, %s810_s29), 0  ;;  %p88_p13 = scmp.eq.s32.totalorder %s302_s27, 3 }
  0x1c   : > { %p648_p11 = por %p57_p9, %p56_p8  ;;  %p652_p12 = por %p82_p10, %p50_p4 }
  0x1d   : > { %s38_s7 = ssub.s32 %s545_s0, %s812_s29  ;;  %p658_p1 = por %p88_p13, %p56_p8 }
  0x1e   : > { %s795_s6 = scalar_select %p652_p12, 1, 0 }
  0x1f   : > { %s40_s8 = sor.u32 %s39_s3, %s38_s7  ;;  %p336_p2 = scmp.lt.s32.totalorder %s549_s25, 4 }
  0x20   : > { %p41_p0 = scmp.eq.s32.totalorder %s40_s8, 0  ;;  %s108_s10 = sand.u32 1, %s529_s21  }
  0x21   : > { %s796_s9 = scalar_select %p658_p1, 1, 0 }
  0x22   : > { %s665_s11 = scalar_select %p41_p0, %s529_s21, %s43_s30  }
  0x23   : > { %s305_s12 = sshll.u32 %s108_s10, 5  ;;  %s322_s13 = sshll.u32 %s545_s0, 3 }
  0x24   : > { %s118_s14 = sadd.s32 %s541_s24, %s322_s13  ;;  %s112_s15 = scalar_lea.vmem [#allocation4], %s305_s12 }
  0x25   : > { %s121_s16 = sshll.u32 %s112_s15, 4  ;;  %s308_s17 = sshll.u32 %s118_s14, 7  ;;  %s669_s16 = int_to_ptr.vmem [resolvable:$true] %s121_s16 }
  0x26   : > { %s674_s27 = scalar_lea.hbm %s790_s1, %s308_s17  ;;  %p678_p3 = pnand %p336_p2, %p640_p6 }
  0x27   : > { %s682_s3 = scalar_lea.sflag [#allocation5], %s108_s10  ;;  %s419_s7 = scalar_lea.hbm %s674_s27, 512 }
  0x28   : > { %p420_p4 = scmp.ne.s32.totalorder %s674_s27, %s419_s7  ;;  %p421_p5 = pneg %p678_p3 }
  0x29   : > { %s424_s12 = scalar_lea.hbm %s790_s1, 2048  ;;  %p425_p6 = scmp.lt.u32.totalorder %s674_s27, %s790_s1 }
  0x2a   : > { %p422_p7 = pnand %p421_p5, %p420_p4  ;;  %p426_p9 = scmp.lt.u32.totalorder %s424_s12, %s419_s7 }
  0x2b   : > { %p428_p13 = scmp.lt.u32.totalorder %s419_s7, %s674_s27 }
  0x2c   : > { %p423_p8 = pneg %p422_p7  ;;  %p427_p10 = por %p426_p9, %p425_p6 }
  0x2e   : > { %p429_p0 = por %p428_p13, %p427_p10 }
  0x30   : > { %p430_p2 = pnand %p429_p0, %p423_p8 }
  0x32   : > { %433 = shalt.err (!%p430_p2)
}
  0x33   : > { %s434_s10 = scalar_lea.vmem %s669_s16, 512  ;;  %s552_s15 = smov [#allocation4]  }
  0x34   : > { %p435_p4 = scmp.ne.s32.totalorder %s669_s16, %s434_s10  ;;  %s439_s17 = sshll.u32 %s552_s15, 4  ;;  %s440_s17 = int_to_ptr.vmem [resolvable:$false] %s439_s17 }
  0x35   : > { %s441_s18 = scalar_lea.vmem %s440_s17, 1024  ;;  %p442_p12 = scmp.lt.s32.totalorder %s669_s16, %s440_s17 }
  0x36   : > { %p437_p7 = pnand %p435_p4, %p421_p5  ;;  %p443_p6 = scmp.lt.s32.totalorder %s441_s18, %s434_s10 }
  0x38   : > { %p438_p1 = pneg %p437_p7  ;;  %p444_p9 = por %p443_p6, %p442_p12 }
  0x3a   : > { %p445_p10 = pnand %p444_p9, %p438_p1 }
  0x3c   : > { %448 = shalt.err (!%p445_p10)
}
  0x3d   : > { %s553_s26 = smov 256   ;;  %s554_s7 = smov 128  }
  0x3e   : > { %s555_s4 = smov 8   ;;  %p309_p5 = scmp.ge.s32.totalorder %s549_s25, 1 }
  0x3f   : > { %331 = dma.hbm_to_vmem [thread:$0]  (!%p678_p3), %s674_s27, 512, %s669_s16, %s682_s3, %s553_s26, %s554_s7, %s555_s4  }
  0x40   : > { %p129_p8 = scmp.lt.s32.totalorder %s549_s25, 5 }
  0x42   : > { %p130_p13 = pnand %p309_p5, %p129_p8 }
  0x43   : > { %s713_s8 = sand.u32 (!%p130_p13), 1, %s525_s20  }
  0x44   : > { %133 = sbr.rel (%p130_p13) target bundleno = 107 (0x6b), region = 24  ;;  %s310_s12 = sshll.u32 (!%p130_p13), %s713_s8, 5 }
  0x45   : > { %s136_s13 = scalar_lea.sflag (!%p130_p13), [#allocation5], %s713_s8  ;;  %s717_s14 = scalar_lea.vmem (!%p130_p13), [#allocation4], %s310_s12 }
  0x4b   : > { %512 = dma.done.wait (%p648_p11), %s136_s13, 512  }
  0x4c   : > { %514 = vsyncadd (%p648_p11), %s136_s13, 4294966784  ;;  %s315_s16 = sshll.u32 %s533_s22, 3  ;;  %v165_v0 = vlaneseq  ;;  %s160_s27 = sld [smem:[#allocation3]]  ;;  %v182_v9 = vld [vmem:[%s717_s14] sm:$0xff]  ;;  %v183_v10 = vld [vmem:[%s717_s14 + $0x8] sm:$0xff]  ;;  %vm192_vm6 = vcmask 130048  }
  0x4d   : > { %s312_s30 = sld [smem:[#allocation3 + $0x1]]  ;;  %v167_v1 = vstv %s315_s16  ;;  %s313_s3 = sld [smem:[#allocation3 + $0x2]]  ;;  %v184_v11 = vld [vmem:[%s717_s14 + $0x10] sm:$0xff]  ;;  %v185_v12 = vld [vmem:[%s717_s14 + $0x18] sm:$0xff] }
  0x4e   : > { %s314_s10 = sld [smem:[#allocation3 + $0x3]]  ;;  %v166_v2 = vshrl.u32 %v165_v0, 7  ;;  %s323_s15 = sshll.u32 %s537_s23, 3  ;;  %v170_v4 = vand.u32 127, %v165_v0 }
  0x4f   : > { %s210_s17 = sadd.s32 %s533_s22, %s323_s15  ;;  %s157_s5 = scalar_lea.vmem [#allocation7], %s310_s12 }
  0x50   : > { %v168_v3 = vadd.s32 %v167_v1, %v166_v2  ;;  %s213_s18 = sshll.u32 %s157_s5, 4  ;;  %s319_s26 = sshll.u32 %s210_s17, 7  ;;  %s728_s18 = int_to_ptr.vmem [resolvable:$true] %s213_s18 }
  0x51   : > { %s735_s7 = scalar_lea.hbm %s791_s2, %s319_s26  ;;  %s198_s4 = scalar_lea.sflag [#allocation6], %s713_s8 }
  0x52   : > { %v171_v5 = vstv %s160_s27  ;;  %s449_s12 = scalar_lea.vmem %s728_s18, 512  ;;  %p798_p12 = scmp.ne.s32.totalorder %s795_s6, 0 }
  0x53   : > { %v173_v6 = vstv %s312_s30  ;;  %vm172_vm0 = vcmp.ge.s32.totalorder %v168_v3, %v171_v5  ;;  %v176_v7 = vstv %s313_s3  ;;  %p450_p11 = scmp.ne.s32.totalorder %s728_s18, %s449_s12  ;;  %s556_s13 = smov [#allocation7]  }
  0x54   : > { %vm174_vm1 = vcmp.lt.s32.totalorder %v168_v3, %v173_v6  ;;  %v179_v8 = vstv %s314_s10  ;;  %vm177_vm3 = vcmp.ge.s32.totalorder %v170_v4, %v176_v7  ;;  %s453_s14 = sshll.u32 %s556_s13, 4  ;;  %s454_s14 = int_to_ptr.vmem [resolvable:$false] %s453_s14 }
  0x55   : > { %vm175_vm2 = vmand %vm172_vm0, %vm174_vm1  ;;  %vm180_vm4 = vcmp.lt.s32.totalorder %v170_v4, %v179_v8  ;;  %p451_p1 = pnand %p450_p11, %p798_p12  ;;  %s455_s16 = scalar_lea.vmem %s454_s14, 1024 }
  0x56   : > { %vm178_vm5 = vmand %vm175_vm2, %vm177_vm3  ;;  %p456_p0 = scmp.lt.s32.totalorder %s728_s18, %s454_s14  ;;  %p457_p2 = scmp.lt.s32.totalorder %s455_s16, %s449_s12 }
  0x57   : > { %vm181_vm7 = vmand %vm178_vm5, %vm180_vm4  ;;  %p452_p3 = pneg %p451_p1 }
  0x58   : > { %v188_v13 = vsel %vm181_vm7, -100.0, %v182_v9  ;;  %v189_v14 = vsel %vm181_vm7, -100.0, %v183_v10  ;;  %v190_v15 = vsel %vm181_vm7, -100.0, %v184_v11  ;;  %v191_v16 = vsel %vm181_vm7, -100.0, %v185_v12  ;;  %p458_p4 = por %p457_p2, %p456_p0 }
  0x59   : > { %193 = vst.msk [vmem:[%s157_s5] sm:$0xff] %vm192_vm6, %v188_v13  ;;  %194 = vst.msk [vmem:[%s157_s5 + $0x8] sm:$0xff] %vm192_vm6, %v189_v14 }
  0x5a   : > { %195 = vst.msk [vmem:[%s157_s5 + $0x10] sm:$0xff] %vm192_vm6, %v190_v15  ;;  %196 = vst.msk [vmem:[%s157_s5 + $0x18] sm:$0xff] %vm192_vm6, %v191_v16  ;;  %p459_p7 = pnand %p458_p4, %p452_p3 }
  0x5c   : > { %462 = shalt.err (!%p459_p7)
}
  0x5d   : > { %s463_s27 = scalar_lea.hbm %s735_s7, 512  ;;  %s467_s10 = scalar_lea.hbm %s791_s2, 2048 }
  0x5e   : > { %p464_p6 = scmp.ne.s32.totalorder %s735_s7, %s463_s27  ;;  %p468_p5 = scmp.lt.u32.totalorder %s735_s7, %s791_s2 }
  0x5f   : > { %p469_p8 = scmp.lt.u32.totalorder %s467_s10, %s463_s27  ;;  %p471_p11 = scmp.lt.u32.totalorder %s463_s27, %s735_s7 }
  0x60   : > { %p465_p9 = pnand %p464_p6, %p798_p12 }
  0x61   : > { %p470_p13 = por %p469_p8, %p468_p5 }
  0x62   : > { %p466_p10 = pneg %p465_p9 }
  0x63   : > { %p472_p1 = por %p471_p11, %p470_p13 }
  0x65   : > { %p473_p3 = pnand %p472_p1, %p466_p10 }
  0x67   : > { %476 = shalt.err (!%p473_p3)
}
  0x68   : > { %s557_s5 = smov 128   ;;  %s558_s26 = smov 256  }
  0x69   : > { %s559_s22 = smov 8  }
  0x6a   : > { %326 = dma.vmem_to_hbm [thread:$0]  (%p798_p12), %s728_s18, 512, %s735_s7, %s198_s4, %s557_s5, %s558_s26, %s559_s22  }
  0x6b PF: > { %p337_p0 = scmp.ge.s32.totalorder %s549_s25, 2  ;;  %s228_s23 = sand.u32 1, %s521_s19  }
  0x6c   : > { %p799_p2 = scmp.ne.s32.totalorder %s796_s9, 0  ;;  %s229_s12 = scalar_lea.sflag [#allocation6], %s228_s23 }
  0x6e   : > { %p333_p4 = pnand %p337_p0, %p799_p2 }
  0x70   : > { %516 = dma.done.wait (!%p333_p4), %s229_s12, 512  }
  0x71   : > { %518 = vsyncadd (!%p333_p4), %s229_s12, 4294966784  ;;  %s22_s25 = sadd.s32 1, %s549_s25   ;;  %s800_s19 = smov %s525_s20 }
  0x72   : > { %p19_p7 = scmp.ge.s32.totalorder %s22_s25, 6   ;;  %s801_s20 = smov %s529_s21 }
  0x73   : > { %s802_s21 = smov %s665_s11  ;;  %s803_s22 = smov %s541_s24 }
  0x74   : > { %s804_s23 = smov %s545_s0  ;;  %s805_s24 = smov %s808_s28 }
  0x75   : > { %s806_s0 = smov %s812_s29  ;;  %21 = sbr.rel (!%p19_p7) target bundleno = 19 (0x13), region = 69 }
  0x7c   :  { %234 = vsyncpa [#allocation5], 1 }
  0x7d   :  { %236 = vsyncpa [#allocation5 + $0x1], 1 }
  0x7e   :  { %237 = vsyncpa [#allocation6], 1 }
  0x7f   :  { %239 = vsyncpa [#allocation6 + $0x1], 1 }

</bundles_post_ra>
